<compile_context>
chip_gen: v7x
topology: tpu7x:2x2x1
jax: 0.10.0
libtpu: 0.0.40
codegen_flags: <defaults>
</compile_context>

<pallas_src>
import jax
import jax.numpy as jnp
from jax.experimental import pallas as pl
from jax.experimental.pallas import tpu as pltpu

HIDDEN1 = 128      # fc1 width (already lane-dense)
HIDDEN2 = 64       # fc2 width (padded to 128 inside the packed params)
PAD = 128          # lane-dense padded width for hidden-2


def _round_up(n, m):
    return ((n + m - 1) // m) * m


def _mlp_kernel(x_ref, w1_ref, b1_ref, w2_ref, b2_ref, w3_ref, b3_ref, o_ref):
    # x tile: (TILE_B, D_in) f32 -> cast dot operands to bf16, accumulate f32.
    x = x_ref[...].astype(jnp.bfloat16)
    h1 = jnp.dot(x, w1_ref[...], preferred_element_type=jnp.float32) + b1_ref[...]
    h1 = jnp.maximum(h1, 0.0)                                       # ReLU (f32)
    h2 = jnp.dot(h1.astype(jnp.bfloat16), w2_ref[...],
                 preferred_element_type=jnp.float32) + b2_ref[...]
    h2 = jnp.maximum(h2, 0.0)                                       # ReLU (f32)
    out = jnp.dot(h2.astype(jnp.bfloat16), w3_ref[...],
                  preferred_element_type=jnp.float32) + b3_ref[...]
    o_ref[...] = out.astype(o_ref.dtype)                            # (TILE_B, out_dim)


def init_params(key, input_dim, output_dim):
    """f32 params with PyTorch nn.Linear-style init, stored transposed as
    (in_features, out_features) so the kernel computes x @ W + b."""
    k1, k2, k3, k4, k5, k6 = jax.random.split(key, 6)

    def uniform_linear(kw, kb, fan_in, fan_out):
        bound = 1.0 / jnp.sqrt(jnp.float32(fan_in))
        w = jax.random.uniform(kw, (fan_in, fan_out), jnp.float32, -bound, bound)
        b = jax.random.uniform(kb, (1, fan_out), jnp.float32, -bound, bound)
        return w, b

    w1, b1 = uniform_linear(k1, k2, input_dim, HIDDEN1)
    w2, b2 = uniform_linear(k3, k4, HIDDEN1, HIDDEN2)
    w3, b3 = uniform_linear(k5, k6, HIDDEN2, output_dim)
    return dict(w1=w1, b1=b1, w2=w2, b2=b2, w3=w3, b3=b3)


def pack_params(params):
    """Pad hidden-2 width to 128 (zero columns / zero rows) so activations stay
    lane-dense; the final layer is packed as (128, out_dim) so the kernel emits
    only the useful output columns. Matmul operands in bf16, biases f32."""
    out_dim = params["w3"].shape[1]
    w1 = params["w1"].astype(jnp.bfloat16)                                    # (D_in, 128)
    b1 = params["b1"].astype(jnp.float32)                                     # (1, 128)
    w2 = jnp.zeros((HIDDEN1, PAD), jnp.float32).at[:, :HIDDEN2].set(params["w2"])
    b2 = jnp.zeros((1, PAD), jnp.float32).at[:, :HIDDEN2].set(params["b2"])
    w3 = jnp.zeros((PAD, out_dim), jnp.float32).at[:HIDDEN2, :].set(params["w3"])
    b3 = params["b3"].astype(jnp.float32)                                     # (1, out_dim)
    return dict(w1=w1, b1=b1,
                w2=w2.astype(jnp.bfloat16), b2=b2,
                w3=w3.astype(jnp.bfloat16), b3=b3), out_dim


def mlp_forward(x, packed, out_dim, *, block_batch=2048):
    """x: (B, input_dim) f32. packed: dict from pack_params. Returns (B, out_dim) f32."""
    B, d_in = x.shape

    # Batch tile: multiple of 8 always, capped by block_batch.
    B8 = _round_up(B, 8)
    tile_b = _round_up(min(block_batch, B8), 8)
    # v7x: if the whole batch fits in <= 2 tiles, split into 2 grid steps so the
    # "parallel" batch axis can shard across both TensorCores (no-op elsewhere).
    if B8 > 8 and B8 <= 2 * tile_b:
        tile_b = max(8, _round_up(pl.cdiv(B8, 2), 8))
    Bp = _round_up(B8, tile_b)
    if Bp != B:
        x = jnp.pad(x, ((0, Bp - B), (0, 0)))

    # Only raise the scoped-VMEM limit (v5e default 16 MiB) if the
    # double-buffered tile footprint would actually exceed it.
    w_bytes = sum(int(v.size) * v.dtype.itemsize for v in packed.values())
    est_bytes = 2 * (tile_b * d_in * 4 + tile_b * out_dim * 4) + 2 * w_bytes
    cp_kwargs = dict(dimension_semantics=("parallel",))      # 2-TC sharding on v7x
    if est_bytes > 12 * (1 << 20):
        cp_kwargs["vmem_limit_bytes"] = min(2 * est_bytes, 100 * (1 << 20))

    const = lambda shape: pl.BlockSpec(shape, lambda i: (0, 0))  # weights stay resident
    out = pl.pallas_call(
        _mlp_kernel,
        out_shape=jax.ShapeDtypeStruct((Bp, out_dim), jnp.float32),
        grid=(Bp // tile_b,),
        in_specs=[
            pl.BlockSpec((tile_b, d_in), lambda i: (i, 0)),
            const(packed["w1"].shape), const(packed["b1"].shape),
            const(packed["w2"].shape), const(packed["b2"].shape),
            const(packed["w3"].shape), const(packed["b3"].shape),
        ],
        out_specs=pl.BlockSpec((tile_b, out_dim), lambda i: (i, 0)),
        compiler_params=pltpu.CompilerParams(**cp_kwargs),
    )(x, packed["w1"], packed["b1"], packed["w2"], packed["b2"],
      packed["w3"], packed["b3"])
    return out if Bp == B else out[:B]


def _reference(x, params):
    ref = jnp.maximum(x @ params["w1"] + params["b1"], 0.0)
    ref = jnp.maximum(ref @ params["w2"] + params["b2"], 0.0)
    return ref @ params["w3"] + params["b3"]


if __name__ == "__main__":
    # LunarLander-v2 discrete: observation dim = 8, action dim = 4.
    input_dim, output_dim, batch = 8, 4, 2

    key = jax.random.PRNGKey(0)
    kx, kx2, kp = jax.random.split(key, 3)
    params = init_params(kp, input_dim, output_dim)
    packed, out_dim = pack_params(params)

    # Small batch (grid = 1 step).
    x = jax.random.normal(kx, (batch, input_dim), jnp.float32)
    q_values = mlp_forward(x, packed, out_dim)
    jax.block_until_ready(q_values)
    assert q_values.shape == (batch, output_dim)
    assert jnp.allclose(q_values, _reference(x, params), atol=2e-2, rtol=2e-2), \
        "mismatch vs reference (small batch)"

    # Larger replay-buffer-style batch exercising multi-step grid + batch padding.
    x2 = jax.random.normal(kx2, (300, input_dim), jnp.float32)
    q2 = mlp_forward(x2, packed, out_dim)
    jax.block_until_ready(q2)
    assert q2.shape == (300, output_dim)
    assert jnp.allclose(q2, _reference(x2, params), atol=2e-2, rtol=2e-2), \
        "mismatch vs reference (batched)"

    print("KERNEL_OK")
</pallas_src>

<mosaic_0001>
module attributes {stable_mosaic.version = 11 : i64} {
  func.func @_mlp_kernel(%arg0: i32, %arg1: memref<8x8xf32, #tpu.memory_space<vmem>>, %arg2: memref<8x128xbf16, #tpu.memory_space<vmem>>, %arg3: memref<1x128xf32, #tpu.memory_space<vmem>>, %arg4: memref<128x128xbf16, #tpu.memory_space<vmem>>, %arg5: memref<1x128xf32, #tpu.memory_space<vmem>>, %arg6: memref<128x4xbf16, #tpu.memory_space<vmem>>, %arg7: memref<1x4xf32, #tpu.memory_space<vmem>>, %arg8: memref<8x4xf32, #tpu.memory_space<vmem>>) attributes {dimension_semantics = [#tpu.dimension_semantics<parallel>], iteration_bounds = array<i64: 1>, scalar_prefetch = 0 : i64, scratch_operands = 0 : i64, tpu.core_type = #tpu.core_type<tc>, window_params = [{transform_indices = @transform_0, window_bounds = array<i64: 8, 8>}, {pipeline_mode = #tpu.pipeline_mode<synchronous>, transform_indices = @transform_1, window_bounds = array<i64: 8, 128>}, {pipeline_mode = #tpu.pipeline_mode<synchronous>, transform_indices = @transform_2, window_bounds = array<i64: 1, 128>}, {pipeline_mode = #tpu.pipeline_mode<synchronous>, transform_indices = @transform_3, window_bounds = array<i64: 128, 128>}, {pipeline_mode = #tpu.pipeline_mode<synchronous>, transform_indices = @transform_4, window_bounds = array<i64: 1, 128>}, {pipeline_mode = #tpu.pipeline_mode<synchronous>, transform_indices = @transform_5, window_bounds = array<i64: 128, 4>}, {pipeline_mode = #tpu.pipeline_mode<synchronous>, transform_indices = @transform_6, window_bounds = array<i64: 1, 4>}, {transform_indices = @transform_7, window_bounds = array<i64: 8, 4>}]} {
    %c0 = arith.constant 0 : index
    %c0_0 = arith.constant 0 : index
    %0 = vector.load %arg1[%c0, %c0_0] : memref<8x8xf32, #tpu.memory_space<vmem>>, vector<8x8xf32>
    %1 = arith.truncf %0 : vector<8x8xf32> to vector<8x8xbf16>
    %c0_1 = arith.constant 0 : index
    %c0_2 = arith.constant 0 : index
    %2 = vector.load %arg2[%c0_1, %c0_2] : memref<8x128xbf16, #tpu.memory_space<vmem>>, vector<8x128xbf16>
    %cst = arith.constant dense<0.000000e+00> : vector<8x128xf32>
    %3 = tpu.matmul %1, %2, %cst {dimension_numbers = #tpu.dot_dimension_numbers<[1], [0], [0], [1], [0, 0, 1, 1], [], []>} : vector<8x8xbf16>, vector<8x128xbf16>, vector<8x128xf32> -> vector<8x128xf32>
    %c0_3 = arith.constant 0 : index
    %c0_4 = arith.constant 0 : index
    %4 = vector.load %arg3[%c0_3, %c0_4] : memref<1x128xf32, #tpu.memory_space<vmem>>, vector<1x128xf32>
    %5 = vector.broadcast %4 : vector<1x128xf32> to vector<8x128xf32>
    %6 = arith.addf %3, %5 : vector<8x128xf32>
    %cst_5 = arith.constant 0.000000e+00 : f32
    %7 = vector.broadcast %cst_5 : f32 to vector<8x128xf32>
    %8 = arith.maximumf %6, %7 : vector<8x128xf32>
    %9 = arith.truncf %8 : vector<8x128xf32> to vector<8x128xbf16>
    %c0_6 = arith.constant 0 : index
    %c0_7 = arith.constant 0 : index
    %10 = vector.load %arg4[%c0_6, %c0_7] : memref<128x128xbf16, #tpu.memory_space<vmem>>, vector<128x128xbf16>
    %cst_8 = arith.constant dense<0.000000e+00> : vector<8x128xf32>
    %11 = tpu.matmul %9, %10, %cst_8 {dimension_numbers = #tpu.dot_dimension_numbers<[1], [0], [0], [1], [0, 0, 1, 1], [], []>} : vector<8x128xbf16>, vector<128x128xbf16>, vector<8x128xf32> -> vector<8x128xf32>
    %c0_9 = arith.constant 0 : index
    %c0_10 = arith.constant 0 : index
    %12 = vector.load %arg5[%c0_9, %c0_10] : memref<1x128xf32, #tpu.memory_space<vmem>>, vector<1x128xf32>
    %13 = vector.broadcast %12 : vector<1x128xf32> to vector<8x128xf32>
    %14 = arith.addf %11, %13 : vector<8x128xf32>
    %cst_11 = arith.constant 0.000000e+00 : f32
    %15 = vector.broadcast %cst_11 : f32 to vector<8x128xf32>
    %16 = arith.maximumf %14, %15 : vector<8x128xf32>
    %17 = arith.truncf %16 : vector<8x128xf32> to vector<8x128xbf16>
    %c0_12 = arith.constant 0 : index
    %c0_13 = arith.constant 0 : index
    %18 = vector.load %arg6[%c0_12, %c0_13] : memref<128x4xbf16, #tpu.memory_space<vmem>>, vector<128x4xbf16>
    %cst_14 = arith.constant dense<0.000000e+00> : vector<8x4xf32>
    %19 = tpu.matmul %17, %18, %cst_14 {dimension_numbers = #tpu.dot_dimension_numbers<[1], [0], [0], [1], [0, 0, 1, 1], [], []>} : vector<8x128xbf16>, vector<128x4xbf16>, vector<8x4xf32> -> vector<8x4xf32>
    %c0_15 = arith.constant 0 : index
    %c0_16 = arith.constant 0 : index
    %20 = vector.load %arg7[%c0_15, %c0_16] : memref<1x4xf32, #tpu.memory_space<vmem>>, vector<1x4xf32>
    %21 = vector.broadcast %20 : vector<1x4xf32> to vector<8x4xf32>
    %22 = arith.addf %19, %21 : vector<8x4xf32>
    %c0_17 = arith.constant 0 : index
    %c0_18 = arith.constant 0 : index
    %23 = vector.load %arg8[%c0_17, %c0_18] : memref<8x4xf32, #tpu.memory_space<vmem>>, vector<8x4xf32>
    tpu.vector_store %arg8[%c0_17, %c0_18], %22 {strides = array<i32>} : memref<8x4xf32, #tpu.memory_space<vmem>>, vector<8x4xf32>,
    return
  }
  func.func @transform_0(%arg0: i32) -> (i32, i32) {
    %c0_i32 = arith.constant 0 : i32
    %c0_i32_0 = arith.constant 0 : i32
    return %arg0, %c0_i32 : i32, i32
  }
  func.func @transform_1(%arg0: i32) -> (i32, i32) {
    %c0_i32 = arith.constant 0 : i32
    %c0_i32_0 = arith.constant 0 : i32
    %c0_i32_1 = arith.constant 0 : i32
    return %c0_i32, %c0_i32_0 : i32, i32
  }
  func.func @transform_2(%arg0: i32) -> (i32, i32) {
    %c0_i32 = arith.constant 0 : i32
    %c0_i32_0 = arith.constant 0 : i32
    %c0_i32_1 = arith.constant 0 : i32
    return %c0_i32, %c0_i32_0 : i32, i32
  }
  func.func @transform_3(%arg0: i32) -> (i32, i32) {
    %c0_i32 = arith.constant 0 : i32
    %c0_i32_0 = arith.constant 0 : i32
    %c0_i32_1 = arith.constant 0 : i32
    return %c0_i32, %c0_i32_0 : i32, i32
  }
  func.func @transform_4(%arg0: i32) -> (i32, i32) {
    %c0_i32 = arith.constant 0 : i32
    %c0_i32_0 = arith.constant 0 : i32
    %c0_i32_1 = arith.constant 0 : i32
    return %c0_i32, %c0_i32_0 : i32, i32
  }
  func.func @transform_5(%arg0: i32) -> (i32, i32) {
    %c0_i32 = arith.constant 0 : i32
    %c0_i32_0 = arith.constant 0 : i32
    %c0_i32_1 = arith.constant 0 : i32
    return %c0_i32, %c0_i32_0 : i32, i32
  }
  func.func @transform_6(%arg0: i32) -> (i32, i32) {
    %c0_i32 = arith.constant 0 : i32
    %c0_i32_0 = arith.constant 0 : i32
    %c0_i32_1 = arith.constant 0 : i32
    return %c0_i32, %c0_i32_0 : i32, i32
  }
  func.func @transform_7(%arg0: i32) -> (i32, i32) {
    %c0_i32 = arith.constant 0 : i32
    %c0_i32_0 = arith.constant 0 : i32
    return %arg0, %c0_i32 : i32, i32
  }
}

</mosaic_0001>

<bundles_post_ra>
// kernel: tpu_custom_call.1
= control target key start
LH: loop header
LB: loop body
LE: loop exit
PB: predicated region body
PF: predicated region fallthrough
CT: control target
= control target key end

     0   :  { %vm41_vm0 = vcmask 1043456   ;;  %v421_v0 = vmov 0.0   ;;  %vm422_vm1 = vmmov 0   ;;  %vm37_vm2 = vcmask 64512   ;;  %s552_s1 = inlined_call_operand.vmem [shape: bf16[8,128], index: 1, kind: input, shape index: {}]   ;;  %s553_s0 = inlined_call_operand.vmem [shape: f32[8,8], index: 0, kind: input, shape index: {}]   ;;  %s554_s3 = inlined_call_operand.vmem [shape: bf16[128,128], index: 3, kind: input, shape index: {}]   ;;  %s555_s5 = inlined_call_operand.vmem [shape: bf16[128,4], index: 5, kind: input, shape index: {}]   ;;  %s556_s2 = inlined_call_operand.vmem [shape: f32[1,128], index: 2, kind: input, shape index: {}]   ;;  %s557_s4 = inlined_call_operand.vmem [shape: f32[1,128], index: 4, kind: input, shape index: {}]   ;;  %s558_s6 = inlined_call_operand.vmem [shape: f32[1,4], index: 6, kind: input, shape index: {}]   ;;  %s559_s7 = inlined_call_operand.vmem [shape: f32[8,4], index: 7, kind: output, shape index: {}]  }
   0x1   :  { %357 = vmatprep.subr.bf16.mxu0 %v421_v0  ;;  %v29_v1 = vld [vmem:[%s552_s1] sm:$0xf]  ;;  %359 = vmatprep.mubr.msk.bf16.mxu0 %vm422_vm1, %v421_v0  ;;  %v406_v6 = vld [vmem:[%s554_s3 + $0x8] sm:$0xff]   ;;  %v407_v7 = vld [vmem:[%s554_s3 + $0x10] sm:$0xff]   ;;  %vm311_vm3 = vcmask 31744  }
   0x2   :  { %v27_v2 = vld [vmem:[%s553_s0] sm:$0xff]  ;;  %v43_v3 = vsel %vm41_vm0, %v29_v1, 0  ;;  %363 = vmatprep.subr.bf16.mxu1 %v421_v0  ;;  %379 = vmatprep.mubr.msk.bf16.mxu1 %vm422_vm1, %v421_v0  ;;  %v408_v8 = vld [vmem:[%s554_s3 + $0x18] sm:$0xff]   ;;  %v410_v10 = vld [vmem:[%s554_s3 + $0x28] sm:$0xff]  }
   0x3   :  { %v28_v4 = vpack.c.bf16 %v27_v2, %v27_v2  ;;  %v405_v5 = vld [vmem:[%s554_s3] sm:$0xff]   ;;  %358 = vmatpush3.bf16.msra.mxu0 %v43_v3  ;;  %v411_v11 = vld [vmem:[%s554_s3 + $0x30] sm:$0xff]   ;;  %v412_v12 = vld [vmem:[%s554_s3 + $0x38] sm:$0xff]  }
   0x4   :  { %364 = vmatpush3.bf16.msra.mxu1 %v405_v5  ;;  %383 = vmatprep.subr.bf16.mxu0 %v421_v0  ;;  %v409_v9 = vld [vmem:[%s554_s3 + $0x20] sm:$0xff]   ;;  %v414_v14 = vld [vmem:[%s555_s5 + $0x8] sm:$0xff]   ;;  %v415_v15 = vld [vmem:[%s555_s5 + $0x10] sm:$0xff]  }
   0x5   :  { %365 = vmatprep.subr.bf16.mxu1 %v421_v0  ;;  %v413_v13 = vld [vmem:[%s555_s5] sm:$0xff]   ;;  %v416_v16 = vld [vmem:[%s555_s5 + $0x18] sm:$0xff]   ;;  %v418_v18 = vld [vmem:[%s555_s5 + $0x28] sm:$0xff]  }
   0x6   :  { %360 = vmatmul.mubr.msk.bf16.vlgmr.msra.gmra.mrb[0].mxu0 %vm37_vm2, %v28_v4  ;;  %v417_v17 = vld [vmem:[%s555_s5 + $0x20] sm:$0xff]   ;;  %v419_v27 = vld [vmem:[%s555_s5 + $0x30] sm:$0xff]   ;;  %v420_v28 = vld [vmem:[%s555_s5 + $0x38] sm:$0xff]  }
   0x7   :  { %399 = vmatprep.mubr.msk.bf16.mxu0 %vm422_vm1, %v421_v0  ;;  %384 = vmatpush3.bf16.msra.mxu0 %v413_v13  ;;  %v317_v19 = vld [vmem:[%s556_s2] ss:$0 sm:$0xff] }
   0x8   :  { %366 = vmatpush3.bf16.msra.mxu1 %v406_v6  ;;  %385 = vmatprep.subr.bf16.mxu0 %v421_v0  ;;  %v319_v29 = vld [vmem:[%s557_s4] ss:$0 sm:$0xff] }
   0x9   :  { %367 = vmatprep.subr.bf16.mxu1 %v421_v0  ;;  %v328_v37 = vld [vmem:[%s558_s6] ss:$0 sm:$0xff] }
   0xb   :  { %386 = vmatpush3.bf16.msra.mxu0 %v414_v14 }
   0xc   :  { %368 = vmatpush3.bf16.msra.mxu1 %v407_v7  ;;  %387 = vmatprep.subr.bf16.mxu0 %v421_v0 }
   0xd   :  { %369 = vmatprep.subr.bf16.mxu1 %v421_v0 }
   0xf   :  { %388 = vmatpush3.bf16.msra.mxu0 %v415_v15 }
  0x10   :  { %370 = vmatpush3.bf16.msra.mxu1 %v408_v8  ;;  %389 = vmatprep.subr.bf16.mxu0 %v421_v0 }
  0x11   :  { %371 = vmatprep.subr.bf16.mxu1 %v421_v0 }
  0x13   :  { %390 = vmatpush3.bf16.msra.mxu0 %v416_v16 }
  0x14   :  { %372 = vmatpush3.bf16.msra.mxu1 %v409_v9  ;;  %391 = vmatprep.subr.bf16.mxu0 %v421_v0 }
  0x15   :  { %373 = vmatprep.subr.bf16.mxu1 %v421_v0 }
  0x17   :  { %392 = vmatpush3.bf16.msra.mxu0 %v417_v17 }
  0x18   :  { %374 = vmatpush3.bf16.msra.mxu1 %v410_v10  ;;  %393 = vmatprep.subr.bf16.mxu0 %v421_v0 }
  0x19   :  { %375 = vmatprep.subr.bf16.mxu1 %v421_v0 }
  0x1b   :  { %394 = vmatpush3.bf16.msra.mxu0 %v418_v18 }
  0x1c   :  { %376 = vmatpush3.bf16.msra.mxu1 %v411_v11  ;;  %395 = vmatprep.subr.bf16.mxu0 %v421_v0 }
  0x1d   :  { %377 = vmatprep.subr.bf16.mxu1 %v421_v0 }
  0x1f   :  { %396 = vmatpush3.bf16.msra.mxu0 %v419_v27 }
  0x20   :  { %378 = vmatpush3.bf16.msra.mxu1 %v412_v12  ;;  %397 = vmatprep.subr.bf16.mxu0 %v421_v0 }
  0x23   :  { %398 = vmatpush3.bf16.msra.mxu0 %v420_v28 }
  0xd9   :  { %v79_v20 = vpop.f32.mrb[0].mxu0 }
  0xda   :  { %v80_v21 = vadd.f32 %v317_v19, %v79_v20  ;;  %v361_v22 = vpop.f32.mrb[1].mxu0 }
  0xdb   :  { %v82_v23 = vpop.f32.mrb[2].mxu0 }
  0xdc   :  { %v85_v24 = vmax.f32 %v80_v21, 0.0  ;;  %v362_v25 = vpop.f32.mrb[3].mxu0 }
  0xde   :  { %v86_v26 = vpack.c.bf16 %v85_v24, %v85_v24 }
  0xe0   :  { %380 = vmatmul.mubr.bf16.vlgmr.msra.gmra.mrb[0].mxu1 %v86_v26 }
 0x1b3   :  { %v192_v30 = vpop.f32.mrb[0].mxu1 }
 0x1b4   :  { %v193_v31 = vadd.f32 %v319_v29, %v192_v30  ;;  %v381_v32 = vpop.f32.mrb[1].mxu1 }
 0x1b5   :  { %v195_v33 = vpop.f32.mrb[2].mxu1 }
 0x1b6   :  { %v198_v34 = vmax.f32 %v193_v31, 0.0  ;;  %v382_v35 = vpop.f32.mrb[3].mxu1 }
 0x1b8   :  { %v199_v36 = vpack.c.bf16 %v198_v34, %v198_v34 }
 0x1ba   :  { %400 = vmatmul.mubr.bf16.vlgmr.msra.gmra.mrb[4].mxu0 %v199_v36 }
 0x28d   :  { %v305_v38 = vpop.f32.mrb[4].mxu0 }
 0x28e   :  { %v306_v39 = vadd.f32 %v328_v37, %v305_v38  ;;  %v401_v40 = vpop.f32.mrb[5].mxu0 }
 0x28f   :  { %v308_v41 = vpop.f32.mrb[6].mxu0 }
 0x290   :  { %312 = vst.msk [vmem:[%s559_s7] sm:$0xff] %vm311_vm3, %v306_v39  ;;  %v402_v42 = vpop.f32.mrb[7].mxu0 }

</bundles_post_ra>
